<compile_context>
chip_gen: v6e
topology: v6e:2x2x1
jax: 0.10.0
libtpu: 0.0.40
codegen_flags: <defaults>
</compile_context>

<pallas_src>
import jax
import jax.numpy as jnp
from jax.experimental import pallas as pl
from jax.experimental.pallas import tpu as pltpu


def _round_up(a: int, m: int) -> int:
    return (a + m - 1) // m * m


def _pca_linear_kernel(x_ref, w_ref, b_ref, o_ref):
    # One MXU matmul per batch tile; f32 accumulation, f32 bias add, cast last.
    acc = jnp.dot(x_ref[...], w_ref[...], preferred_element_type=jnp.float32)
    o_ref[...] = (acc + b_ref[...]).astype(o_ref.dtype)
    # NOTE: with N=32 the output store is lane-sparse (masked vst). If this
    # layer is ever applied to >=4 heads at once, batch them so the output's
    # last dim is a multiple of 128 for unmasked, lane-dense stores.


def _pca_linear_pallas(x, w_eff, b2d, *, block_b: int, compute_dtype):
    """y = x @ w_eff + b2d, tiled (and software-pipelined) over the batch dim."""
    B, F = x.shape
    N = w_eff.shape[1]

    # Batch tile must be a multiple of 8 sublanes (or the full padded batch).
    b_padded = _round_up(max(B, 8), 8)
    tb = min(block_b, b_padded)
    b_padded = _round_up(b_padded, tb)

    x_c = x.astype(compute_dtype)
    if b_padded != B:
        x_c = jnp.pad(x_c, ((0, b_padded - B), (0, 0)))

    grid = (b_padded // tb,)

    out = pl.pallas_call(
        _pca_linear_kernel,
        out_shape=jax.ShapeDtypeStruct((b_padded, N), x.dtype),
        grid=grid,
        in_specs=[
            # x: streamed per batch tile (double-buffered by the Pallas pipeline).
            pl.BlockSpec((tb, F), lambda i: (i, 0)),
            # W_eff / bias: tiny, whole-array blocks that stay resident in VMEM.
            pl.BlockSpec((F, N), lambda i: (0, 0)),
            pl.BlockSpec((1, N), lambda i: (0, 0)),
        ],
        out_specs=pl.BlockSpec((tb, N), lambda i: (i, 0)),
        compiler_params=pltpu.CompilerParams(
            # Batch tiles are independent -> shard the grid across TCs on v7x.
            dimension_semantics=("parallel",),
        ),
        cost_estimate=pl.CostEstimate(
            flops=2 * b_padded * F * N,
            transcendentals=0,
            bytes_accessed=(
                x_c.size * x_c.dtype.itemsize
                + w_eff.size * w_eff.dtype.itemsize
                + b2d.size * b2d.dtype.itemsize
                + b_padded * N * x.dtype.itemsize
            ),
        ),
    )(x_c, w_eff, b2d)

    return out[:B] if b_padded != B else out


def make_pca_linear(num_neurons, weight, bias, projection_matrix, which="top",
                    *, block_b=512, compute_dtype=jnp.bfloat16):
    """Build the PCALinear forward fn (mirrors the PyTorch module __init__).

    weight: [out_features, num_neurons] (nn.Linear layout), bias: [out_features],
    projection_matrix: [num_fts, num_fts].
    All parameter-side work (column slice, transpose, fold, dtype cast) happens
    once here, so the per-call hot path only touches x.
    """
    if which == "top":
        projection = projection_matrix[:, :num_neurons]
    else:
        projection = projection_matrix[:, -num_neurons:]

    # Fold the two static matmuls: (x @ P) @ W.T == x @ (P @ W.T).
    w_eff = (projection.astype(jnp.float32)
             @ weight.astype(jnp.float32).T).astype(compute_dtype)   # [F, N]
    b2d = bias.reshape(1, -1).astype(jnp.float32)                    # [1, N]

    @jax.jit
    def apply(x):
        return _pca_linear_pallas(x, w_eff, b2d,
                                  block_b=block_b, compute_dtype=compute_dtype)

    return apply


if __name__ == "__main__":
    # num_fts (F) = 128, num_neurons (K) = 64, out_features (N) = 32.
    # B = 1024 with block_b = 512 exercises a 2-step pipelined batch grid.
    B, F, K, N = 1024, 128, 64, 32

    key = jax.random.PRNGKey(0)
    kx, kp, kw, kb = jax.random.split(key, 4)

    x = jax.random.normal(kx, (B, F), dtype=jnp.float32)
    # full PCA projection matrix is [F, F]; which='top' takes the first K columns
    projection_matrix = jax.random.normal(kp, (F, F), dtype=jnp.float32) / jnp.sqrt(F)
    # nn.Linear(in_features=K, out_features=N)
    weight = jax.random.normal(kw, (N, K), dtype=jnp.float32) / jnp.sqrt(K)
    bias = jax.random.normal(kb, (N,), dtype=jnp.float32)

    pca_linear = make_pca_linear(K, weight, bias, projection_matrix, which="top",
                                 block_b=512, compute_dtype=jnp.bfloat16)
    out = jax.block_until_ready(pca_linear(x))

    # Reference: exact module semantics, y = (x @ P) @ W.T + b.
    projection = projection_matrix[:, :K]
    ref = (x @ projection) @ weight.T + bias
    assert out.shape == (B, N)
    # bf16 operands with f32 accumulation: expected error ~ sqrt(F) * 2^-9 * |term| ~ 1e-2.
    assert jnp.allclose(out, ref, atol=5e-2, rtol=5e-2), "mismatch vs reference"

    print("KERNEL_OK")
</pallas_src>

<mosaic_0001>
module attributes {stable_mosaic.version = 11 : i64} {
  func.func @_pca_linear_kernel(%arg0: i32, %arg1: memref<512x128xbf16, #tpu.memory_space<vmem>>, %arg2: memref<128x32xbf16, #tpu.memory_space<vmem>>, %arg3: memref<1x32xf32, #tpu.memory_space<vmem>>, %arg4: memref<512x32xf32, #tpu.memory_space<vmem>>) attributes {dimension_semantics = [#tpu.dimension_semantics<parallel>], iteration_bounds = array<i64: 2>, scalar_prefetch = 0 : i64, scratch_operands = 0 : i64, tpu.core_type = #tpu.core_type<tc>, window_params = [{transform_indices = @transform_0, window_bounds = array<i64: 512, 128>}, {pipeline_mode = #tpu.pipeline_mode<synchronous>, transform_indices = @transform_1, window_bounds = array<i64: 128, 32>}, {pipeline_mode = #tpu.pipeline_mode<synchronous>, transform_indices = @transform_2, window_bounds = array<i64: 1, 32>}, {transform_indices = @transform_3, window_bounds = array<i64: 512, 32>}]} {
    %c0 = arith.constant 0 : index
    %c0_0 = arith.constant 0 : index
    %0 = vector.load %arg1[%c0, %c0_0] : memref<512x128xbf16, #tpu.memory_space<vmem>>, vector<512x128xbf16>
    %c0_1 = arith.constant 0 : index
    %c0_2 = arith.constant 0 : index
    %1 = vector.load %arg2[%c0_1, %c0_2] : memref<128x32xbf16, #tpu.memory_space<vmem>>, vector<128x32xbf16>
    %cst = arith.constant dense<0.000000e+00> : vector<512x32xf32>
    %2 = tpu.matmul %0, %1, %cst {dimension_numbers = #tpu.dot_dimension_numbers<[1], [0], [0], [1], [0, 0, 1, 1], [], []>} : vector<512x128xbf16>, vector<128x32xbf16>, vector<512x32xf32> -> vector<512x32xf32>
    %c0_3 = arith.constant 0 : index
    %c0_4 = arith.constant 0 : index
    %3 = vector.load %arg3[%c0_3, %c0_4] : memref<1x32xf32, #tpu.memory_space<vmem>>, vector<1x32xf32>
    %4 = vector.broadcast %3 : vector<1x32xf32> to vector<512x32xf32>
    %5 = arith.addf %2, %4 : vector<512x32xf32>
    %c0_5 = arith.constant 0 : index
    %c0_6 = arith.constant 0 : index
    %6 = vector.load %arg4[%c0_5, %c0_6] : memref<512x32xf32, #tpu.memory_space<vmem>>, vector<512x32xf32>
    tpu.vector_store %arg4[%c0_5, %c0_6], %5 {strides = array<i32>} : memref<512x32xf32, #tpu.memory_space<vmem>>, vector<512x32xf32>,
    return
  }
  func.func @transform_0(%arg0: i32) -> (i32, i32) {
    %c0_i32 = arith.constant 0 : i32
    %c0_i32_0 = arith.constant 0 : i32
    return %arg0, %c0_i32 : i32, i32
  }
  func.func @transform_1(%arg0: i32) -> (i32, i32) {
    %c0_i32 = arith.constant 0 : i32
    %c0_i32_0 = arith.constant 0 : i32
    %c0_i32_1 = arith.constant 0 : i32
    return %c0_i32, %c0_i32_0 : i32, i32
  }
  func.func @transform_2(%arg0: i32) -> (i32, i32) {
    %c0_i32 = arith.constant 0 : i32
    %c0_i32_0 = arith.constant 0 : i32
    %c0_i32_1 = arith.constant 0 : i32
    return %c0_i32, %c0_i32_0 : i32, i32
  }
  func.func @transform_3(%arg0: i32) -> (i32, i32) {
    %c0_i32 = arith.constant 0 : i32
    %c0_i32_0 = arith.constant 0 : i32
    return %arg0, %c0_i32 : i32, i32
  }
}

</mosaic_0001>

<bundles_post_ra>
// kernel: apply.1
= control target key start
LH: loop header
LB: loop body
LE: loop exit
PB: predicated region body
PF: predicated region fallthrough
CT: control target
= control target key end

     0   :  { %s1176_s12 = smov 0   ;;  %s1454_s0 = inlined_call_operand.vmem [shape: bf16[1024,128], index: 0, kind: input, shape index: {}]   ;;  %s1455_s1 = inlined_call_operand.vmem [shape: bf16[128,32], index: 1, kind: input, shape index: {}]   ;;  %s1456_s2 = inlined_call_operand.vmem [shape: f32[1,32], index: 2, kind: input, shape index: {}]   ;;  %s1457_s3 = inlined_call_operand.vmem [shape: f32[1024,32], index: 3, kind: output, shape index: {}]  }
   0x1 LB: > { %s912_s13 = sadd.s32 4294967295, %s1154_s12   ;;  %p916_p0 = scmp.ge.s32.totalorder %s1154_s12, 1  ;;  %s1154_s12 = sphi %s1176_s12, %s13_s12  }
   0x2   : > { %p138_p1 = scmp.lt.s32.totalorder %s1154_s12, 3 }
   0x4   : > { %p139_p2 = pnand %p916_p0, %p138_p1 }
   0x5   : > { %s917_s16 = sshll.u32 (!%p139_p2), %s912_s13, 6 }
   0x6   : > { %142 = sbr.rel (%p139_p2) target bundleno = 302 (0x12e), region = 32  ;;  %p163_p3 = scmp.lt.s32.totalorder (!%p139_p2), %s917_s16, 127 }
   0xb   : > { %v1108_v0 = vld [vmem:[%s1455_s1 + $0x38] sm:$0xff]   ;;  %v1109_v1 = vld [vmem:[%s1455_s1 + $0x30] sm:$0xff]   ;;  %s1459_s16 = smov (!%p163_p3, %s917_s16), 127  ;;  %v1110_v2 = vld [vmem:[%s1455_s1 + $0x28] sm:$0xff]   ;;  %vm791_vm0 = vcmask 261120  }
   0xc   : > { %1004 = vmatprep.subr.bf16.mxu0 %v1108_v0  ;;  %1084 = vmatprep.subr.bf16.mxu1 %v1108_v0  ;;  %s918_s21 = sshll.u32 %s1459_s16, 2  ;;  %v1111_v3 = vld [vmem:[%s1455_s1 + $0x20] sm:$0xff]   ;;  %v1112_v6 = vld [vmem:[%s1455_s1 + $0x18] sm:$0xff]   ;;  %v1113_v7 = vld [vmem:[%s1455_s1 + $0x10] sm:$0xff]   ;;  %s920_s8 = sshll.u32 %s1459_s16, 3 }
   0xd   : > { %1005 = vmatpush3.bf16.msra.mxu0 %v1108_v0  ;;  %1092 = vmatpush3.bf16.msra.mxu1 %v1108_v0  ;;  %s1199_s24 = scalar_lea.vmem %s1454_s0, %s918_s21  ;;  %v1114_v8 = vld [vmem:[%s1455_s1 + $0x8] sm:$0xff]   ;;  %v1115_v9 = vld [vmem:[%s1455_s1] sm:$0xff]   ;;  %s1257_s14 = scalar_lea.vmem %s1457_s3, %s920_s8 }
   0xe   : > { %1006 = vmatprep.subr.bf16.mxu0 %v1109_v1  ;;  %1085 = vmatprep.subr.bf16.mxu1 %v1109_v1  ;;  %v1116_v4 = vld [vmem:[%s1199_s24] sm:$0xff]   ;;  %v1118_v10 = vld [vmem:[%s1199_s24 + $0x8] sm:$0xff]   ;;  %v1120_v12 = vld [vmem:[%s1199_s24 + $0x10] sm:$0xff]  }
   0xf   : > { %v1117_v5 = vld [vmem:[%s1199_s24 + $0x80] sm:$0xff]   ;;  %1020 = vmatprep.mubr.bf16.mxu0 %v1116_v4  ;;  %v1119_v11 = vld [vmem:[%s1199_s24 + $0x88] sm:$0xff]   ;;  %v1121_v13 = vld [vmem:[%s1199_s24 + $0x90] sm:$0xff]  }
  0x10   : > { %1052 = vmatprep.mubr.bf16.mxu1 %v1117_v5  ;;  %v1122_v14 = vld [vmem:[%s1199_s24 + $0x18] sm:$0xff]   ;;  %v1124_v16 = vld [vmem:[%s1199_s24 + $0x20] sm:$0xff]   ;;  %v1126_v18 = vld [vmem:[%s1199_s24 + $0x28] sm:$0xff]  }
  0x11   : > { %1007 = vmatpush3.bf16.msra.mxu0 %v1109_v1  ;;  %1093 = vmatpush3.bf16.msra.mxu1 %v1109_v1  ;;  %v1123_v15 = vld [vmem:[%s1199_s24 + $0x98] sm:$0xff]   ;;  %v1125_v17 = vld [vmem:[%s1199_s24 + $0xa0] sm:$0xff]   ;;  %v1127_v19 = vld [vmem:[%s1199_s24 + $0xa8] sm:$0xff]  }
  0x12   : > { %1008 = vmatprep.subr.bf16.mxu0 %v1110_v2  ;;  %1086 = vmatprep.subr.bf16.mxu1 %v1110_v2  ;;  %v1128_v20 = vld [vmem:[%s1199_s24 + $0x30] sm:$0xff]   ;;  %v1130_v22 = vld [vmem:[%s1199_s24 + $0x38] sm:$0xff]   ;;  %v1132_v24 = vld [vmem:[%s1199_s24 + $0x40] sm:$0xff]  }
  0x13   : > { %v1129_v21 = vld [vmem:[%s1199_s24 + $0xb0] sm:$0xff]   ;;  %v1131_v23 = vld [vmem:[%s1199_s24 + $0xb8] sm:$0xff]   ;;  %v1133_v25 = vld [vmem:[%s1199_s24 + $0xc0] sm:$0xff]  }
  0x14   : > { %v1134_v26 = vld [vmem:[%s1199_s24 + $0x48] sm:$0xff]   ;;  %v1136_v28 = vld [vmem:[%s1199_s24 + $0x50] sm:$0xff]   ;;  %v1138_v30 = vld [vmem:[%s1199_s24 + $0x58] sm:$0xff]  }
  0x15   : > { %1009 = vmatpush3.bf16.msra.mxu0 %v1110_v2  ;;  %1094 = vmatpush3.bf16.msra.mxu1 %v1110_v2  ;;  %v1135_v27 = vld [vmem:[%s1199_s24 + $0xc8] sm:$0xff]   ;;  %v1137_v29 = vld [vmem:[%s1199_s24 + $0xd0] sm:$0xff]   ;;  %v1139_v31 = vld [vmem:[%s1199_s24 + $0xd8] sm:$0xff]  }
  0x16   : > { %1010 = vmatprep.subr.bf16.mxu0 %v1111_v3  ;;  %1087 = vmatprep.subr.bf16.mxu1 %v1111_v3  ;;  %v1140_v32 = vld [vmem:[%s1199_s24 + $0x60] sm:$0xff]   ;;  %v1142_v34 = vld [vmem:[%s1199_s24 + $0x68] sm:$0xff]   ;;  %v1144_v36 = vld [vmem:[%s1199_s24 + $0x70] sm:$0xff]  }
  0x17   : > { %v1141_v33 = vld [vmem:[%s1199_s24 + $0xe0] sm:$0xff]   ;;  %v1143_v35 = vld [vmem:[%s1199_s24 + $0xe8] sm:$0xff]   ;;  %v1145_v37 = vld [vmem:[%s1199_s24 + $0xf0] sm:$0xff]  }
  0x18   : > { %v1146_v38 = vld [vmem:[%s1199_s24 + $0x78] sm:$0xff]   ;;  %v1252_v40 = vld [vmem:[%s1456_s2] ss:$0 sm:$0xff] }
  0x19   : > { %1011 = vmatpush3.bf16.msra.mxu0 %v1111_v3  ;;  %1095 = vmatpush3.bf16.msra.mxu1 %v1111_v3  ;;  %v1147_v39 = vld [vmem:[%s1199_s24 + $0xf8] sm:$0xff]  }
  0x1a   : > { %1012 = vmatprep.subr.bf16.mxu0 %v1112_v6  ;;  %1088 = vmatprep.subr.bf16.mxu1 %v1112_v6 }
  0x1d   : > { %1013 = vmatpush3.bf16.msra.mxu0 %v1112_v6  ;;  %1096 = vmatpush3.bf16.msra.mxu1 %v1112_v6 }
  0x1e   : > { %1014 = vmatprep.subr.bf16.mxu0 %v1113_v7  ;;  %1089 = vmatprep.subr.bf16.mxu1 %v1113_v7 }
  0x21   : > { %1015 = vmatpush3.bf16.msra.mxu0 %v1113_v7  ;;  %1097 = vmatpush3.bf16.msra.mxu1 %v1113_v7 }
  0x22   : > { %1016 = vmatprep.subr.bf16.mxu0 %v1114_v8  ;;  %1090 = vmatprep.subr.bf16.mxu1 %v1114_v8 }
  0x25   : > { %1017 = vmatpush3.bf16.msra.mxu0 %v1114_v8  ;;  %1098 = vmatpush3.bf16.msra.mxu1 %v1114_v8 }
  0x26   : > { %1018 = vmatprep.subr.bf16.mxu0 %v1115_v9  ;;  %1091 = vmatprep.subr.bf16.mxu1 %v1115_v9 }
  0x29   : > { %1019 = vmatpush3.bf16.msra.mxu0 %v1115_v9  ;;  %1099 = vmatpush3.bf16.msra.mxu1 %v1115_v9 }
  0x2c   : > { %1021 = vmatmul.mubr.bf16.vlgmr.msra.gmra.mxu0 %v1118_v10  ;;  %1053 = vmatmul.mubr.bf16.vlgmr.msra.gmra.mxu1 %v1119_v11 }
  0x2d   : > { %1024 = vmatprep.mubr.bf16.mxu0 %v1120_v12  ;;  %1056 = vmatprep.mubr.bf16.mxu1 %v1121_v13 }
  0x34   : > { %1025 = vmatmul.mubr.bf16.gmra.mxu0 %v1122_v14  ;;  %1057 = vmatmul.mubr.bf16.gmra.mxu1 %v1123_v15 }
  0x35   : > { %1028 = vmatprep.mubr.bf16.mxu0 %v1124_v16  ;;  %1060 = vmatprep.mubr.bf16.mxu1 %v1125_v17 }
  0x3c   : > { %1029 = vmatmul.mubr.bf16.gmra.mxu0 %v1126_v18  ;;  %1061 = vmatmul.mubr.bf16.gmra.mxu1 %v1127_v19 }
  0x3d   : > { %1032 = vmatprep.mubr.bf16.mxu0 %v1128_v20  ;;  %1064 = vmatprep.mubr.bf16.mxu1 %v1129_v21 }
  0x44   : > { %1033 = vmatmul.mubr.bf16.gmra.mxu0 %v1130_v22  ;;  %1065 = vmatmul.mubr.bf16.gmra.mxu1 %v1131_v23 }
  0x45   : > { %1036 = vmatprep.mubr.bf16.mxu0 %v1132_v24  ;;  %1068 = vmatprep.mubr.bf16.mxu1 %v1133_v25 }
  0x4c   : > { %1037 = vmatmul.mubr.bf16.gmra.mxu0 %v1134_v26  ;;  %1069 = vmatmul.mubr.bf16.gmra.mxu1 %v1135_v27 }
  0x4d   : > { %1040 = vmatprep.mubr.bf16.mxu0 %v1136_v28  ;;  %1072 = vmatprep.mubr.bf16.mxu1 %v1137_v29 }
  0x54   : > { %1041 = vmatmul.mubr.bf16.gmra.mxu0 %v1138_v30  ;;  %1073 = vmatmul.mubr.bf16.gmra.mxu1 %v1139_v31 }
  0x55   : > { %1044 = vmatprep.mubr.bf16.mxu0 %v1140_v32  ;;  %1076 = vmatprep.mubr.bf16.mxu1 %v1141_v33 }
  0x5c   : > { %1045 = vmatmul.mubr.bf16.gmra.mxu0 %v1142_v34  ;;  %1077 = vmatmul.mubr.bf16.gmra.mxu1 %v1143_v35 }
  0x5d   : > { %1048 = vmatprep.mubr.bf16.mxu0 %v1144_v36  ;;  %1080 = vmatprep.mubr.bf16.mxu1 %v1145_v37 }
  0x64   : > { %1049 = vmatmul.mubr.bf16.gmra.mxu0 %v1146_v38  ;;  %1081 = vmatmul.mubr.bf16.gmra.mxu1 %v1147_v39 }
  0xec   : > { %v1022_v41 = vpop.f32.mrf.mxu0  ;;  %v1054_v42 = vpop.f32.mrf.mxu1 }
  0xed   : > { %v545_v43 = vadd.f32 %v1022_v41, %v1252_v40  ;;  %v673_v44 = vadd.f32 %v1054_v42, %v1252_v40 }
  0xee   : > { %v536_v45 = vpop.f32.mrf.mxu0  ;;  %v664_v46 = vpop.f32.mrf.mxu1 }
  0xef   : > { %794 = vst.msk [vmem:[%s1257_s14 + $0x10] sm:$0xff] %vm791_vm0, %v545_v43  ;;  %826 = vst.msk [vmem:[%s1257_s14 + $0x110] sm:$0xff] %vm791_vm0, %v673_v44  ;;  %v537_v47 = vadd.f32 %v1252_v40, %v536_v45  ;;  %v665_v48 = vadd.f32 %v1252_v40, %v664_v46 }
  0xf0   : > { %v1023_v49 = vpop.f32.mrf.mxu0  ;;  %v1055_v50 = vpop.f32.mrf.mxu1 }
  0xf1   : > { %792 = vst.msk [vmem:[%s1257_s14] sm:$0xff] %vm791_vm0, %v537_v47  ;;  %824 = vst.msk [vmem:[%s1257_s14 + $0x100] sm:$0xff] %vm791_vm0, %v665_v48  ;;  %v548_v51 = vadd.f32 %v1023_v49, %v1252_v40  ;;  %v676_v52 = vadd.f32 %v1055_v50, %v1252_v40 }
  0xf2   : > { %v539_v53 = vpop.f32.mrf.mxu0  ;;  %v667_v54 = vpop.f32.mrf.mxu1 }
  0xf3   : > { %795 = vst.msk [vmem:[%s1257_s14 + $0x18] sm:$0xff] %vm791_vm0, %v548_v51  ;;  %827 = vst.msk [vmem:[%s1257_s14 + $0x118] sm:$0xff] %vm791_vm0, %v676_v52  ;;  %v540_v55 = vadd.f32 %v1252_v40, %v539_v53  ;;  %v668_v56 = vadd.f32 %v1252_v40, %v667_v54 }
  0xf4   : > { %v1026_v57 = vpop.f32.mrf.mxu0  ;;  %v1058_v58 = vpop.f32.mrf.mxu1 }
  0xf5   : > { %793 = vst.msk [vmem:[%s1257_s14 + $0x8] sm:$0xff] %vm791_vm0, %v540_v55  ;;  %825 = vst.msk [vmem:[%s1257_s14 + $0x108] sm:$0xff] %vm791_vm0, %v668_v56  ;;  %v561_v59 = vadd.f32 %v1026_v57, %v1252_v40  ;;  %v689_v60 = vadd.f32 %v1058_v58, %v1252_v40 }
  0xf6   : > { %v552_v61 = vpop.f32.mrf.mxu0  ;;  %v680_v62 = vpop.f32.mrf.mxu1 }
  0xf7   : > { %798 = vst.msk [vmem:[%s1257_s14 + $0x30] sm:$0xff] %vm791_vm0, %v561_v59  ;;  %830 = vst.msk [vmem:[%s1257_s14 + $0x130] sm:$0xff] %vm791_vm0, %v689_v60  ;;  %v553_v63 = vadd.f32 %v1252_v40, %v552_v61  ;;  %v681_v0 = vadd.f32 %v1252_v40, %v680_v62 }
  0xf8   : > { %v1027_v1 = vpop.f32.mrf.mxu0  ;;  %v1059_v2 = vpop.f32.mrf.mxu1 }
  0xf9   : > { %796 = vst.msk [vmem:[%s1257_s14 + $0x20] sm:$0xff] %vm791_vm0, %v553_v63  ;;  %828 = vst.msk [vmem:[%s1257_s14 + $0x120] sm:$0xff] %vm791_vm0, %v681_v0  ;;  %v564_v3 = vadd.f32 %v1027_v1, %v1252_v40  ;;  %v692_v4 = vadd.f32 %v1059_v2, %v1252_v40 }
  0xfa   : > { %v555_v5 = vpop.f32.mrf.mxu0  ;;  %v683_v6 = vpop.f32.mrf.mxu1 }
  0xfb   : > { %799 = vst.msk [vmem:[%s1257_s14 + $0x38] sm:$0xff] %vm791_vm0, %v564_v3  ;;  %831 = vst.msk [vmem:[%s1257_s14 + $0x138] sm:$0xff] %vm791_vm0, %v692_v4  ;;  %v556_v7 = vadd.f32 %v1252_v40, %v555_v5  ;;  %v684_v8 = vadd.f32 %v1252_v40, %v683_v6 }
  0xfc   : > { %v1030_v9 = vpop.f32.mrf.mxu0  ;;  %v1062_v10 = vpop.f32.mrf.mxu1 }
  0xfd   : > { %797 = vst.msk [vmem:[%s1257_s14 + $0x28] sm:$0xff] %vm791_vm0, %v556_v7  ;;  %829 = vst.msk [vmem:[%s1257_s14 + $0x128] sm:$0xff] %vm791_vm0, %v684_v8  ;;  %v577_v11 = vadd.f32 %v1030_v9, %v1252_v40  ;;  %v705_v12 = vadd.f32 %v1062_v10, %v1252_v40 }
  0xfe   : > { %v568_v13 = vpop.f32.mrf.mxu0  ;;  %v696_v14 = vpop.f32.mrf.mxu1 }
  0xff   : > { %802 = vst.msk [vmem:[%s1257_s14 + $0x50] sm:$0xff] %vm791_vm0, %v577_v11  ;;  %834 = vst.msk [vmem:[%s1257_s14 + $0x150] sm:$0xff] %vm791_vm0, %v705_v12  ;;  %v569_v15 = vadd.f32 %v1252_v40, %v568_v13  ;;  %v697_v16 = vadd.f32 %v1252_v40, %v696_v14 }
 0x100   : > { %v1031_v17 = vpop.f32.mrf.mxu0  ;;  %v1063_v18 = vpop.f32.mrf.mxu1 }
 0x101   : > { %800 = vst.msk [vmem:[%s1257_s14 + $0x40] sm:$0xff] %vm791_vm0, %v569_v15  ;;  %832 = vst.msk [vmem:[%s1257_s14 + $0x140] sm:$0xff] %vm791_vm0, %v697_v16  ;;  %v580_v19 = vadd.f32 %v1031_v17, %v1252_v40  ;;  %v708_v20 = vadd.f32 %v1063_v18, %v1252_v40 }
 0x102   : > { %v571_v21 = vpop.f32.mrf.mxu0  ;;  %v699_v22 = vpop.f32.mrf.mxu1 }
 0x103   : > { %803 = vst.msk [vmem:[%s1257_s14 + $0x58] sm:$0xff] %vm791_vm0, %v580_v19  ;;  %835 = vst.msk [vmem:[%s1257_s14 + $0x158] sm:$0xff] %vm791_vm0, %v708_v20  ;;  %v572_v23 = vadd.f32 %v1252_v40, %v571_v21  ;;  %v700_v24 = vadd.f32 %v1252_v40, %v699_v22 }
 0x104   : > { %v1034_v25 = vpop.f32.mrf.mxu0  ;;  %v1066_v26 = vpop.f32.mrf.mxu1 }
 0x105   : > { %801 = vst.msk [vmem:[%s1257_s14 + $0x48] sm:$0xff] %vm791_vm0, %v572_v23  ;;  %833 = vst.msk [vmem:[%s1257_s14 + $0x148] sm:$0xff] %vm791_vm0, %v700_v24  ;;  %v593_v27 = vadd.f32 %v1034_v25, %v1252_v40  ;;  %v721_v28 = vadd.f32 %v1066_v26, %v1252_v40 }
 0x106   : > { %v584_v29 = vpop.f32.mrf.mxu0  ;;  %v712_v30 = vpop.f32.mrf.mxu1 }
 0x107   : > { %806 = vst.msk [vmem:[%s1257_s14 + $0x70] sm:$0xff] %vm791_vm0, %v593_v27  ;;  %838 = vst.msk [vmem:[%s1257_s14 + $0x170] sm:$0xff] %vm791_vm0, %v721_v28  ;;  %v585_v31 = vadd.f32 %v1252_v40, %v584_v29  ;;  %v713_v32 = vadd.f32 %v1252_v40, %v712_v30 }
 0x108   : > { %v1035_v33 = vpop.f32.mrf.mxu0  ;;  %v1067_v34 = vpop.f32.mrf.mxu1 }
 0x109   : > { %804 = vst.msk [vmem:[%s1257_s14 + $0x60] sm:$0xff] %vm791_vm0, %v585_v31  ;;  %836 = vst.msk [vmem:[%s1257_s14 + $0x160] sm:$0xff] %vm791_vm0, %v713_v32  ;;  %v596_v35 = vadd.f32 %v1035_v33, %v1252_v40  ;;  %v724_v36 = vadd.f32 %v1067_v34, %v1252_v40 }
 0x10a   : > { %v587_v37 = vpop.f32.mrf.mxu0  ;;  %v715_v38 = vpop.f32.mrf.mxu1 }
 0x10b   : > { %807 = vst.msk [vmem:[%s1257_s14 + $0x78] sm:$0xff] %vm791_vm0, %v596_v35  ;;  %839 = vst.msk [vmem:[%s1257_s14 + $0x178] sm:$0xff] %vm791_vm0, %v724_v36  ;;  %v588_v39 = vadd.f32 %v1252_v40, %v587_v37  ;;  %v716_v41 = vadd.f32 %v1252_v40, %v715_v38 }
 0x10c   : > { %v1038_v42 = vpop.f32.mrf.mxu0  ;;  %v1070_v43 = vpop.f32.mrf.mxu1 }
 0x10d   : > { %805 = vst.msk [vmem:[%s1257_s14 + $0x68] sm:$0xff] %vm791_vm0, %v588_v39  ;;  %837 = vst.msk [vmem:[%s1257_s14 + $0x168] sm:$0xff] %vm791_vm0, %v716_v41  ;;  %v609_v44 = vadd.f32 %v1038_v42, %v1252_v40  ;;  %v737_v45 = vadd.f32 %v1070_v43, %v1252_v40 }
 0x10e   : > { %v600_v46 = vpop.f32.mrf.mxu0  ;;  %v728_v47 = vpop.f32.mrf.mxu1 }
 0x10f   : > { %810 = vst.msk [vmem:[%s1257_s14 + $0x90] sm:$0xff] %vm791_vm0, %v609_v44  ;;  %842 = vst.msk [vmem:[%s1257_s14 + $0x190] sm:$0xff] %vm791_vm0, %v737_v45  ;;  %v601_v48 = vadd.f32 %v1252_v40, %v600_v46  ;;  %v729_v49 = vadd.f32 %v1252_v40, %v728_v47 }
 0x110   : > { %v1039_v50 = vpop.f32.mrf.mxu0  ;;  %v1071_v51 = vpop.f32.mrf.mxu1 }
 0x111   : > { %808 = vst.msk [vmem:[%s1257_s14 + $0x80] sm:$0xff] %vm791_vm0, %v601_v48  ;;  %840 = vst.msk [vmem:[%s1257_s14 + $0x180] sm:$0xff] %vm791_vm0, %v729_v49  ;;  %v612_v52 = vadd.f32 %v1039_v50, %v1252_v40  ;;  %v740_v53 = vadd.f32 %v1071_v51, %v1252_v40 }
 0x112   : > { %v603_v54 = vpop.f32.mrf.mxu0  ;;  %v731_v55 = vpop.f32.mrf.mxu1 }
 0x113   : > { %811 = vst.msk [vmem:[%s1257_s14 + $0x98] sm:$0xff] %vm791_vm0, %v612_v52  ;;  %843 = vst.msk [vmem:[%s1257_s14 + $0x198] sm:$0xff] %vm791_vm0, %v740_v53  ;;  %v604_v56 = vadd.f32 %v1252_v40, %v603_v54  ;;  %v732_v57 = vadd.f32 %v1252_v40, %v731_v55 }
 0x114   : > { %v1042_v58 = vpop.f32.mrf.mxu0  ;;  %v1074_v59 = vpop.f32.mrf.mxu1 }
 0x115   : > { %809 = vst.msk [vmem:[%s1257_s14 + $0x88] sm:$0xff] %vm791_vm0, %v604_v56  ;;  %841 = vst.msk [vmem:[%s1257_s14 + $0x188] sm:$0xff] %vm791_vm0, %v732_v57  ;;  %v625_v60 = vadd.f32 %v1042_v58, %v1252_v40  ;;  %v753_v61 = vadd.f32 %v1074_v59, %v1252_v40 }
 0x116   : > { %v616_v62 = vpop.f32.mrf.mxu0  ;;  %v744_v63 = vpop.f32.mrf.mxu1 }
 0x117   : > { %814 = vst.msk [vmem:[%s1257_s14 + $0xb0] sm:$0xff] %vm791_vm0, %v625_v60  ;;  %846 = vst.msk [vmem:[%s1257_s14 + $0x1b0] sm:$0xff] %vm791_vm0, %v753_v61  ;;  %v617_v0 = vadd.f32 %v1252_v40, %v616_v62  ;;  %v745_v1 = vadd.f32 %v1252_v40, %v744_v63 }
 0x118   : > { %v1043_v2 = vpop.f32.mrf.mxu0  ;;  %v1075_v3 = vpop.f32.mrf.mxu1 }
 0x119   : > { %812 = vst.msk [vmem:[%s1257_s14 + $0xa0] sm:$0xff] %vm791_vm0, %v617_v0  ;;  %844 = vst.msk [vmem:[%s1257_s14 + $0x1a0] sm:$0xff] %vm791_vm0, %v745_v1  ;;  %v628_v4 = vadd.f32 %v1043_v2, %v1252_v40  ;;  %v756_v5 = vadd.f32 %v1075_v3, %v1252_v40 }
 0x11a   : > { %v619_v6 = vpop.f32.mrf.mxu0  ;;  %v747_v7 = vpop.f32.mrf.mxu1 }
 0x11b   : > { %815 = vst.msk [vmem:[%s1257_s14 + $0xb8] sm:$0xff] %vm791_vm0, %v628_v4  ;;  %847 = vst.msk [vmem:[%s1257_s14 + $0x1b8] sm:$0xff] %vm791_vm0, %v756_v5  ;;  %v620_v8 = vadd.f32 %v1252_v40, %v619_v6  ;;  %v748_v9 = vadd.f32 %v1252_v40, %v747_v7 }
 0x11c   : > { %v1046_v10 = vpop.f32.mrf.mxu0  ;;  %v1078_v11 = vpop.f32.mrf.mxu1 }
 0x11d   : > { %813 = vst.msk [vmem:[%s1257_s14 + $0xa8] sm:$0xff] %vm791_vm0, %v620_v8  ;;  %845 = vst.msk [vmem:[%s1257_s14 + $0x1a8] sm:$0xff] %vm791_vm0, %v748_v9  ;;  %v641_v12 = vadd.f32 %v1046_v10, %v1252_v40  ;;  %v769_v13 = vadd.f32 %v1078_v11, %v1252_v40 }
 0x11e   : > { %v632_v14 = vpop.f32.mrf.mxu0  ;;  %v760_v15 = vpop.f32.mrf.mxu1 }
 0x11f   : > { %818 = vst.msk [vmem:[%s1257_s14 + $0xd0] sm:$0xff] %vm791_vm0, %v641_v12  ;;  %850 = vst.msk [vmem:[%s1257_s14 + $0x1d0] sm:$0xff] %vm791_vm0, %v769_v13  ;;  %v633_v16 = vadd.f32 %v1252_v40, %v632_v14  ;;  %v761_v17 = vadd.f32 %v1252_v40, %v760_v15 }
 0x120   : > { %v1047_v18 = vpop.f32.mrf.mxu0  ;;  %v1079_v19 = vpop.f32.mrf.mxu1 }
 0x121   : > { %816 = vst.msk [vmem:[%s1257_s14 + $0xc0] sm:$0xff] %vm791_vm0, %v633_v16  ;;  %848 = vst.msk [vmem:[%s1257_s14 + $0x1c0] sm:$0xff] %vm791_vm0, %v761_v17  ;;  %v644_v20 = vadd.f32 %v1047_v18, %v1252_v40  ;;  %v772_v21 = vadd.f32 %v1079_v19, %v1252_v40 }
 0x122   : > { %v635_v22 = vpop.f32.mrf.mxu0  ;;  %v763_v23 = vpop.f32.mrf.mxu1 }
 0x123   : > { %819 = vst.msk [vmem:[%s1257_s14 + $0xd8] sm:$0xff] %vm791_vm0, %v644_v20  ;;  %851 = vst.msk [vmem:[%s1257_s14 + $0x1d8] sm:$0xff] %vm791_vm0, %v772_v21  ;;  %v636_v24 = vadd.f32 %v1252_v40, %v635_v22  ;;  %v764_v25 = vadd.f32 %v1252_v40, %v763_v23 }
 0x124   : > { %v1050_v26 = vpop.f32.mrf.mxu0  ;;  %v1082_v27 = vpop.f32.mrf.mxu1 }
 0x125   : > { %817 = vst.msk [vmem:[%s1257_s14 + $0xc8] sm:$0xff] %vm791_vm0, %v636_v24  ;;  %849 = vst.msk [vmem:[%s1257_s14 + $0x1c8] sm:$0xff] %vm791_vm0, %v764_v25  ;;  %v657_v28 = vadd.f32 %v1050_v26, %v1252_v40  ;;  %v785_v29 = vadd.f32 %v1082_v27, %v1252_v40 }
 0x126   : > { %v648_v30 = vpop.f32.mrf.mxu0  ;;  %v776_v31 = vpop.f32.mrf.mxu1 }
 0x127   : > { %822 = vst.msk [vmem:[%s1257_s14 + $0xf0] sm:$0xff] %vm791_vm0, %v657_v28  ;;  %854 = vst.msk [vmem:[%s1257_s14 + $0x1f0] sm:$0xff] %vm791_vm0, %v785_v29  ;;  %v649_v32 = vadd.f32 %v1252_v40, %v648_v30  ;;  %v777_v33 = vadd.f32 %v1252_v40, %v776_v31 }
 0x128   : > { %v1051_v34 = vpop.f32.mrf.mxu0  ;;  %v1083_v35 = vpop.f32.mrf.mxu1 }
 0x129   : > { %820 = vst.msk [vmem:[%s1257_s14 + $0xe0] sm:$0xff] %vm791_vm0, %v649_v32  ;;  %852 = vst.msk [vmem:[%s1257_s14 + $0x1e0] sm:$0xff] %vm791_vm0, %v777_v33  ;;  %v660_v36 = vadd.f32 %v1051_v34, %v1252_v40  ;;  %v788_v37 = vadd.f32 %v1083_v35, %v1252_v40 }
 0x12a   : > { %v651_v38 = vpop.f32.mrf.mxu0  ;;  %v779_v39 = vpop.f32.mrf.mxu1 }
 0x12b   : > { %823 = vst.msk [vmem:[%s1257_s14 + $0xf8] sm:$0xff] %vm791_vm0, %v660_v36  ;;  %855 = vst.msk [vmem:[%s1257_s14 + $0x1f8] sm:$0xff] %vm791_vm0, %v788_v37  ;;  %v652_v41 = vadd.f32 %v1252_v40, %v651_v38  ;;  %v780_v42 = vadd.f32 %v1252_v40, %v779_v39 }
 0x12d   : > { %821 = vst.msk [vmem:[%s1257_s14 + $0xe8] sm:$0xff] %vm791_vm0, %v652_v41  ;;  %853 = vst.msk [vmem:[%s1257_s14 + $0x1e8] sm:$0xff] %vm791_vm0, %v780_v42 }
 0x12e PF: > { %s13_s12 = sadd.s32 1, %s1154_s12  }
 0x12f   : > { %p10_p4 = scmp.ge.s32.totalorder %s13_s12, 4  }
 0x131   :  { %12 = sbr.rel (!%p10_p4) target bundleno = 1 (0x1), region = 62 }

</bundles_post_ra>
